<compile_context>
chip_gen: v7x
topology: tpu7x:2x2x1
jax: 0.10.0
libtpu: 0.0.40
codegen_flags: <defaults>
</compile_context>

<pallas_src>
import functools

import jax
import jax.numpy as jnp
from jax.experimental import pallas as pl
from jax.experimental.pallas import tpu as pltpu


def _round_up(x: int, m: int) -> int:
    return (x + m - 1) // m * m


def _mmea_kernel(e1_ref, r_ref, e2_ref, o_ref):
    """One row-tile of MMEA: DistMA + ComplEx scores and their sum."""
    e1 = e1_ref[...]
    r = r_ref[...]
    e2 = e2_ref[...]

    d = e1.shape[1]
    d2 = d // 2
    d4 = d // 4

    # --- MMEA top-level chunk (halves along the feature dim) ---
    e1_1, e1_2 = e1[:, :d2], e1[:, d2:]
    r_1, r_2 = r[:, :d2], r[:, d2:]
    e2_1, e2_2 = e2[:, :d2], e2[:, d2:]

    # --- DistMA on the first halves ---
    E1 = jnp.sum(e1_1 * r_1 + e1_1 * e2_1 + r_1 * e2_1, axis=1, keepdims=True)

    # --- ComplEx on the second halves (real / imaginary quarters) ---
    e1r, e1i = e1_2[:, :d4], e1_2[:, d4:]
    rr, ri = r_2[:, :d4], r_2[:, d4:]
    e2r, e2i = e2_2[:, :d4], e2_2[:, d4:]
    E2 = jnp.sum(
        e1r * rr * e2r + e1r * ri * e2i + e1i * rr * e2i - e1i * ri * e2r,
        axis=1,
        keepdims=True,
    )

    E = E1 + E2
    o_ref[...] = jnp.concatenate([E1, E2, E], axis=1).astype(o_ref.dtype)


@functools.partial(jax.jit, static_argnames=("tb",))
def mmea_forward(e1, r, e2, *, tb: int = 128):
    """MMEA.forward (eval mode). e1, r, e2: (B, D) f32, D divisible by 4."""
    B, D = e1.shape
    assert r.shape == (B, D) and e2.shape == (B, D)
    assert D % 4 == 0, "MMEA requires the feature dim to be divisible by 4"

    # Row tile: multiple of 8 (sublane), no larger than the padded batch.
    tb = max(8, min(_round_up(tb, 8), _round_up(B, 8)))
    Bp = _round_up(B, tb)
    if Bp != B:
        pad = ((0, Bp - B), (0, 0))
        e1 = jnp.pad(e1, pad)
        r = jnp.pad(r, pad)
        e2 = jnp.pad(e2, pad)

    grid = (Bp // tb,)
    in_spec = pl.BlockSpec((tb, D), lambda i: (i, 0))
    out_spec = pl.BlockSpec((tb, 3), lambda i: (i, 0))

    d2, d4 = D // 2, D // 4
    cost = pl.CostEstimate(
        flops=Bp * (6 * d2 + 12 * d4 + 1),
        transcendentals=0,
        bytes_accessed=3 * Bp * D * 4 + Bp * 3 * 4,
    )

    out = pl.pallas_call(
        _mmea_kernel,
        out_shape=jax.ShapeDtypeStruct((Bp, 3), jnp.float32),
        grid=grid,
        in_specs=[in_spec, in_spec, in_spec],
        out_specs=out_spec,
        compiler_params=pltpu.CompilerParams(
            dimension_semantics=("parallel",),  # v7x: 2 TCs split row tiles
        ),
        cost_estimate=cost,
    )(e1, r, e2)

    return out[:B]


def _mmea_reference(e1, r, e2):
    """Pure-JAX reference of the same forward pass."""
    B, D = e1.shape
    d2, d4 = D // 2, D // 4
    e1_1, e1_2 = e1[:, :d2], e1[:, d2:]
    r_1, r_2 = r[:, :d2], r[:, d2:]
    e2_1, e2_2 = e2[:, :d2], e2[:, d2:]
    E1 = (e1_1 * r_1 + e1_1 * e2_1 + r_1 * e2_1).sum(axis=1)
    e1r, e1i = e1_2[:, :d4], e1_2[:, d4:]
    rr, ri = r_2[:, :d4], r_2[:, d4:]
    e2r, e2i = e2_2[:, :d4], e2_2[:, d4:]
    E2 = (e1r * rr * e2r + e1r * ri * e2i + e1i * rr * e2i - e1i * ri * e2r).sum(axis=1)
    E = E1 + E2
    return jnp.stack([E1, E2, E], axis=1)


if __name__ == "__main__":
    key = jax.random.PRNGKey(0)
    B, D = 512, 32              # small shapes; D divisible by 4; grid = 4 row tiles
    k1, k2, k3 = jax.random.split(key, 3)
    e1 = jax.random.normal(k1, (B, D), jnp.float32)
    r = jax.random.normal(k2, (B, D), jnp.float32)
    e2 = jax.random.normal(k3, (B, D), jnp.float32)

    out = mmea_forward(e1, r, e2, tb=128)
    out = jax.block_until_ready(out)

    ref = _mmea_reference(e1, r, e2)
    assert out.shape == (B, 3), out.shape
    assert jnp.allclose(out, ref, atol=1e-4, rtol=1e-4), "mismatch vs reference"
    # E column must equal E1 + E2
    assert jnp.allclose(out[:, 2], out[:, 0] + out[:, 1], atol=1e-4, rtol=1e-4)

    print("KERNEL_OK")
</pallas_src>

<mosaic_0001>
module attributes {stable_mosaic.version = 11 : i64} {
  func.func @_mmea_kernel(%arg0: i32, %arg1: memref<128x32xf32, #tpu.memory_space<vmem>>, %arg2: memref<128x32xf32, #tpu.memory_space<vmem>>, %arg3: memref<128x32xf32, #tpu.memory_space<vmem>>, %arg4: memref<128x3xf32, #tpu.memory_space<vmem>>) attributes {dimension_semantics = [#tpu.dimension_semantics<parallel>], iteration_bounds = array<i64: 4>, scalar_prefetch = 0 : i64, scratch_operands = 0 : i64, tpu.core_type = #tpu.core_type<tc>, window_params = [{transform_indices = @transform_0, window_bounds = array<i64: 128, 32>}, {transform_indices = @transform_1, window_bounds = array<i64: 128, 32>}, {transform_indices = @transform_2, window_bounds = array<i64: 128, 32>}, {transform_indices = @transform_3, window_bounds = array<i64: 128, 3>}]} {
    %c0 = arith.constant 0 : index
    %c0_0 = arith.constant 0 : index
    %0 = vector.load %arg1[%c0, %c0_0] : memref<128x32xf32, #tpu.memory_space<vmem>>, vector<128x32xf32>
    %c0_1 = arith.constant 0 : index
    %c0_2 = arith.constant 0 : index
    %1 = vector.load %arg2[%c0_1, %c0_2] : memref<128x32xf32, #tpu.memory_space<vmem>>, vector<128x32xf32>
    %c0_3 = arith.constant 0 : index
    %c0_4 = arith.constant 0 : index
    %2 = vector.load %arg3[%c0_3, %c0_4] : memref<128x32xf32, #tpu.memory_space<vmem>>, vector<128x32xf32>
    %3 = vector.extract_strided_slice %0 {offsets = [0, 0], sizes = [128, 16], strides = [1, 1]} : vector<128x32xf32> to vector<128x16xf32>
    %4 = vector.extract_strided_slice %0 {offsets = [0, 16], sizes = [128, 16], strides = [1, 1]} : vector<128x32xf32> to vector<128x16xf32>
    %5 = vector.extract_strided_slice %1 {offsets = [0, 0], sizes = [128, 16], strides = [1, 1]} : vector<128x32xf32> to vector<128x16xf32>
    %6 = vector.extract_strided_slice %1 {offsets = [0, 16], sizes = [128, 16], strides = [1, 1]} : vector<128x32xf32> to vector<128x16xf32>
    %7 = vector.extract_strided_slice %2 {offsets = [0, 0], sizes = [128, 16], strides = [1, 1]} : vector<128x32xf32> to vector<128x16xf32>
    %8 = vector.extract_strided_slice %2 {offsets = [0, 16], sizes = [128, 16], strides = [1, 1]} : vector<128x32xf32> to vector<128x16xf32>
    %9 = arith.mulf %3, %5 : vector<128x16xf32>
    %10 = arith.mulf %3, %7 : vector<128x16xf32>
    %11 = arith.addf %9, %10 : vector<128x16xf32>
    %12 = arith.mulf %5, %7 : vector<128x16xf32>
    %13 = arith.addf %11, %12 : vector<128x16xf32>
    %cst = arith.constant dense<0.000000e+00> : vector<128xf32>
    %14 = vector.multi_reduction <add>, %13, %cst [1] : vector<128x16xf32> to vector<128xf32>
    %15 = vector.shape_cast %14 : vector<128xf32> to vector<128x1xf32>
    %16 = vector.extract_strided_slice %4 {offsets = [0, 0], sizes = [128, 8], strides = [1, 1]} : vector<128x16xf32> to vector<128x8xf32>
    %17 = vector.extract_strided_slice %4 {offsets = [0, 8], sizes = [128, 8], strides = [1, 1]} : vector<128x16xf32> to vector<128x8xf32>
    %18 = vector.extract_strided_slice %6 {offsets = [0, 0], sizes = [128, 8], strides = [1, 1]} : vector<128x16xf32> to vector<128x8xf32>
    %19 = vector.extract_strided_slice %6 {offsets = [0, 8], sizes = [128, 8], strides = [1, 1]} : vector<128x16xf32> to vector<128x8xf32>
    %20 = vector.extract_strided_slice %8 {offsets = [0, 0], sizes = [128, 8], strides = [1, 1]} : vector<128x16xf32> to vector<128x8xf32>
    %21 = vector.extract_strided_slice %8 {offsets = [0, 8], sizes = [128, 8], strides = [1, 1]} : vector<128x16xf32> to vector<128x8xf32>
    %22 = arith.mulf %16, %18 : vector<128x8xf32>
    %23 = arith.mulf %22, %20 : vector<128x8xf32>
    %24 = arith.mulf %16, %19 : vector<128x8xf32>
    %25 = arith.mulf %24, %21 : vector<128x8xf32>
    %26 = arith.addf %23, %25 : vector<128x8xf32>
    %27 = arith.mulf %17, %18 : vector<128x8xf32>
    %28 = arith.mulf %27, %21 : vector<128x8xf32>
    %29 = arith.addf %26, %28 : vector<128x8xf32>
    %30 = arith.mulf %17, %19 : vector<128x8xf32>
    %31 = arith.mulf %30, %20 : vector<128x8xf32>
    %32 = arith.subf %29, %31 : vector<128x8xf32>
    %cst_5 = arith.constant dense<0.000000e+00> : vector<128xf32>
    %33 = vector.multi_reduction <add>, %32, %cst_5 [1] : vector<128x8xf32> to vector<128xf32>
    %34 = vector.shape_cast %33 : vector<128xf32> to vector<128x1xf32>
    %35 = arith.addf %15, %34 : vector<128x1xf32>
    %36 = tpu.concatenate %15, %34, %35 in 1 : vector<128x1xf32>, vector<128x1xf32>, vector<128x1xf32> -> vector<128x3xf32>
    %c0_6 = arith.constant 0 : index
    %c0_7 = arith.constant 0 : index
    %37 = vector.load %arg4[%c0_6, %c0_7] : memref<128x3xf32, #tpu.memory_space<vmem>>, vector<128x3xf32>
    tpu.vector_store %arg4[%c0_6, %c0_7], %36 {strides = array<i32>} : memref<128x3xf32, #tpu.memory_space<vmem>>, vector<128x3xf32>,
    return
  }
  func.func @transform_0(%arg0: i32) -> (i32, i32) {
    %c0_i32 = arith.constant 0 : i32
    %c0_i32_0 = arith.constant 0 : i32
    return %arg0, %c0_i32 : i32, i32
  }
  func.func @transform_1(%arg0: i32) -> (i32, i32) {
    %c0_i32 = arith.constant 0 : i32
    %c0_i32_0 = arith.constant 0 : i32
    return %arg0, %c0_i32 : i32, i32
  }
  func.func @transform_2(%arg0: i32) -> (i32, i32) {
    %c0_i32 = arith.constant 0 : i32
    %c0_i32_0 = arith.constant 0 : i32
    return %arg0, %c0_i32 : i32, i32
  }
  func.func @transform_3(%arg0: i32) -> (i32, i32) {
    %c0_i32 = arith.constant 0 : i32
    %c0_i32_0 = arith.constant 0 : i32
    return %arg0, %c0_i32 : i32, i32
  }
}

</mosaic_0001>

<bundles_post_ra>
// kernel: mmea_forward.1
= control target key start
LH: loop header
LB: loop body
LE: loop exit
PB: predicated region body
PF: predicated region fallthrough
CT: control target
= control target key end

     0   :  { %s1208_s12 = smov 0   ;;  %s2070_s0 = inlined_call_operand.vmem [shape: f32[512,32], index: 0, kind: input, shape index: {}]   ;;  %s2071_s1 = inlined_call_operand.vmem [shape: f32[512,32], index: 1, kind: input, shape index: {}]   ;;  %s2072_s2 = inlined_call_operand.vmem [shape: f32[512,32], index: 2, kind: input, shape index: {}]   ;;  %s2073_s3 = inlined_call_operand.vmem [shape: f32[512,3], index: 3, kind: output, shape index: {}]  }
   0x1 LB: > { %s1151_s13 = sadd.s32 4294967295, %s1183_s12   ;;  %p1155_p0 = scmp.ge.s32.totalorder %s1183_s12, 1  ;;  %s1183_s12 = sphi %s1208_s12, %s13_s12  }
   0x2   : > { %p160_p1 = scmp.lt.s32.totalorder %s1183_s12, 5 }
   0x4   : > { %p161_p2 = pnand %p1155_p0, %p160_p1 }
   0x6   : > { %164 = sbr.rel (%p161_p2) target bundleno = 662 (0x296), region = 32 }
   0xd   : > { %s1156_s14 = sshll.u32 %s1151_s13, 4  ;;  %vm346_vm0 = vcmask 130048   ;;  %s1185_s25 = smov 120   ;;  %vm955_vm1 = vcmask 64512   ;;  %vm1020_vm2 = vcmask 7168   ;;  %vm1037_vm3 = vcmask 15360  }
   0xe   : > { %p195_p3 = scmp.lt.s32.totalorder %s1156_s14, 63  ;;  %s1186_s26 = smov 8   ;;  %vm1054_vm4 = vcmask 23552  }
   0xf   : > { %s1187_s27 = smov 112  }
  0x10   : > { %s2268_s14 = smov (!%p195_p3, %s1156_s14), 63 }
  0x11   : > { %s1216_s15 = sshll.u32 %s2268_s14, 3 }
  0x12   : > { %s1222_s18 = scalar_lea.vmem %s2070_s0, %s1216_s15  ;;  %s1228_s21 = scalar_lea.vmem %s2071_s1, %s1216_s15 }
  0x13   : > { %s1234_s24 = scalar_lea.vmem %s2072_s2, %s1216_s15  ;;  %v1237_v0 = vld [vmem:[%s1222_s18 + $0x10] sm:$0xff]  ;;  %v1243_v2 = vld [vmem:[%s1222_s18] sm:$0xff]  ;;  %v1269_v11 = vld [vmem:[%s1222_s18 + $0x18] sm:$0xff]  ;;  %s1969_s30 = scalar_lea.vmem %s2073_s3, %s1216_s15 }
  0x14   : > { %v1240_v1 = vld [vmem:[%s1228_s21 + $0x10] sm:$0xff]  ;;  %v1253_v5 = vld [vmem:[%s1228_s21] sm:$0xff]  ;;  %v1272_v12 = vld [vmem:[%s1228_s21 + $0x18] sm:$0xff] }
  0x15   : > { %v1246_v3 = vld [vmem:[%s1234_s24 + $0x10] sm:$0xff]  ;;  %v1250_v4 = vmul.f32 %v1240_v1, %v1237_v0  ;;  %v1256_v6 = vld [vmem:[%s1234_s24] sm:$0xff]  ;;  %v1264_v9 = vmul.f32 %v1253_v5, %v1243_v2  ;;  %v1275_v13 = vld [vmem:[%s1234_s24 + $0x18] sm:$0xff]  ;;  %v1281_v15 = vmul.f32 %v1272_v12, %v1269_v11 }
  0x16   : > { %v284_v7 = vmul.f32 %v1246_v3, %v1237_v0  ;;  %v316_v8 = vmul.f32 %v1246_v3, %v1240_v1  ;;  %v282_v10 = vmul.f32 %v1256_v6, %v1243_v2  ;;  %v314_v14 = vmul.f32 %v1256_v6, %v1253_v5  ;;  %v1288_v18 = vld [vmem:[%s1222_s18 + $0x8] sm:$0xff]  ;;  %v1323_v32 = vld [vmem:[%s1222_s18 + $0x20] sm:$0xff]  ;;  %v1335_v39 = vld [vmem:[%s1222_s18 + $0x38] sm:$0xff] }
  0x17   : > { %2136 = vst [vmem:[#allocation2_spill] sm:$0xff] %v1250_v4  ;;  %2137 = vst [vmem:[#allocation3_spill] sm:$0xff] %v1264_v9  ;;  %v285_v16 = vmul.f32 %v1275_v13, %v1269_v11  ;;  %v317_v17 = vmul.f32 %v1275_v13, %v1272_v12  ;;  %v1291_v19 = vld [vmem:[%s1228_s21 + $0x8] sm:$0xff]  ;;  %v1326_v33 = vld [vmem:[%s1228_s21 + $0x20] sm:$0xff] }
  0x18   : > { %2138 = vst [vmem:[#allocation4_spill] sm:$0xff] %v1281_v15  ;;  %v1294_v20 = vld [vmem:[%s1234_s24 + $0x8] sm:$0xff]  ;;  %v300_v21 = vadd.f32 %v284_v7, %v1250_v4  ;;  %v298_v22 = vadd.f32 %v282_v10, %v1264_v9  ;;  %v1300_v23 = vmul.f32 %v1291_v19, %v1288_v18  ;;  %v1329_v34 = vld [vmem:[%s1234_s24 + $0x20] sm:$0xff]  ;;  %v1338_v40 = vld [vmem:[%s1228_s21 + $0x38] sm:$0xff]  ;;  %v1343_v43 = vmul.f32 %v1326_v33, %v1323_v32 }
  0x19   : > { %v283_v24 = vmul.f32 %v1294_v20, %v1288_v18  ;;  %v1305_v25 = vld [vmem:[%s1222_s18 + $0x28] sm:$0xff]  ;;  %v301_v28 = vadd.f32 %v285_v16, %v1281_v15  ;;  %v315_v29 = vmul.f32 %v1294_v20, %v1291_v19  ;;  %v286_v44 = vmul.f32 %v1329_v34, %v1323_v32  ;;  %v1348_v45 = vld [vmem:[%s1234_s24 + $0x38] sm:$0xff]  ;;  %v1351_v46 = vld [vmem:[%s1222_s18 + $0x30] sm:$0xff] }
  0x1a   : > { %2139 = vst [vmem:[#allocation5_spill] sm:$0xff] %v1300_v23  ;;  %v1308_v26 = vld [vmem:[%s1228_s21 + $0x28] sm:$0xff]  ;;  %v332_v35 = vadd.f32 %v316_v8, %v300_v21  ;;  %v330_v36 = vadd.f32 %v314_v14, %v298_v22  ;;  %2141 = vst [vmem:[#allocation7_spill] sm:$0xff] %v1343_v43  ;;  %v1354_v47 = vld [vmem:[%s1228_s21 + $0x30] sm:$0xff]  ;;  %v318_v51 = vmul.f32 %v1329_v34, %v1326_v33 }
  0x1b   : > { %v1311_v27 = vld [vmem:[%s1234_s24 + $0x28] sm:$0xff]  ;;  %v1318_v30 = vmul.f32 %v1308_v26, %v1305_v25  ;;  %v299_v37 = vadd.f32 %v283_v24, %v1300_v23  ;;  %v333_v41 = vadd.f32 %v317_v17, %v301_v28  ;;  %v1361_v52 = vld [vmem:[%s1234_s24 + $0x30] sm:$0xff]  ;;  %v302_v55 = vadd.f32 %v286_v44, %v1343_v43  ;;  %v1388_v7 = vld [vmem:[%s1222_s18 + $0x40] sm:$0xff] }
  0x1c   : > { %v287_v31 = vmul.f32 %v1311_v27, %v1305_v25  ;;  %v319_v38 = vmul.f32 %v1311_v27, %v1308_v26  ;;  %v353_v48 = vsel %vm346_vm0, %v332_v35, 0.0  ;;  %v347_v49 = vsel %vm346_vm0, %v330_v36, 0.0  ;;  %v1370_v57 = vld [vmem:[%s1222_s18 + $0x48] sm:$0xff]  ;;  %v1391_v8 = vld [vmem:[%s1228_s21 + $0x40] sm:$0xff]  ;;  %v1402_v22 = vld [vmem:[%s1222_s18 + $0x58] sm:$0xff] }
  0x1d   : > { %2140 = vst [vmem:[#allocation6_spill] sm:$0xff] %v1318_v30  ;;  %v331_v50 = vadd.f32 %v315_v29, %v299_v37  ;;  %354 = vadd.xlane.f32.xlu1 %v353_v48  ;;  %348 = vadd.xlane.f32.xlu0 %v347_v49  ;;  %v356_v53 = vsel %vm346_vm0, %v333_v41, 0.0  ;;  %v1367_v56 = vmul.f32 %v1338_v40, %v1335_v39  ;;  %2143 = vst [vmem:[#allocation9_spill] sm:$0xff] %v1370_v57  ;;  %v1373_v58 = vld [vmem:[%s1228_s21 + $0x48] sm:$0xff]  ;;  %v1394_v10 = vld [vmem:[%s1234_s24 + $0x40] sm:$0xff] }
  0x1e   : > { %v303_v42 = vadd.f32 %v287_v31, %v1318_v30  ;;  %v1376_v59 = vld [vmem:[%s1234_s24 + $0x48] sm:$0xff]  ;;  %v289_v61 = vmul.f32 %v1348_v45, %v1335_v39  ;;  %v321_v62 = vmul.f32 %v1348_v45, %v1338_v40  ;;  %v1385_v63 = vmul.f32 %v1354_v47, %v1351_v46  ;;  %2146 = vst [vmem:[#allocation12_spill] sm:$0xff] %v1402_v22  ;;  %v1405_v24 = vld [vmem:[%s1228_s21 + $0x58] sm:$0xff]  ;;  %v1428_v44 = vld [vmem:[%s1222_s18 + $0x50] sm:$0xff] }
  0x1f   : > { %2142 = vst [vmem:[#allocation8_spill] sm:$0xff] %v1367_v56  ;;  %2144 = vst [vmem:[#allocation10_spill] sm:$0xff] %v1376_v59  ;;  %v350_v60 = vsel %vm346_vm0, %v331_v50, 0.0  ;;  %v334_v16 = vadd.f32 %v318_v51, %v302_v55  ;;  %v288_v17 = vmul.f32 %v1361_v52, %v1351_v46  ;;  %v320_v21 = vmul.f32 %v1361_v52, %v1354_v47  ;;  %v1417_v36 = vld [vmem:[%s1234_s24 + $0x58] sm:$0xff]  ;;  %v1431_v48 = vld [vmem:[%s1228_s21 + $0x50] sm:$0xff] }
  0x20   : > { %v335_v54 = vadd.f32 %v319_v38, %v303_v42  ;;  %2145 = vst [vmem:[#allocation11_spill] sm:$0xff] %v1385_v63  ;;  %v305_v28 = vadd.f32 %v289_v61, %v1367_v56  ;;  %v1410_v29 = vmul.f32 %v1373_v58, %v1370_v57  ;;  %v291_v31 = vmul.f32 %v1376_v59, %v1370_v57  ;;  %v1434_v49 = vld [vmem:[%s1234_s24 + $0x50] sm:$0xff]  ;;  %v1474_v30 = vld [vmem:[%s1234_s24 + $0x60] sm:$0xff] }
  0x21   : > { %v323_v35 = vmul.f32 %v1376_v59, %v1373_v58  ;;  %2148 = vst [vmem:[#allocation14_spill] sm:$0xff] %v1417_v36  ;;  %357 = vadd.xlane.f32.xlu1 %v356_v53  ;;  %351 = vadd.xlane.f32.xlu0 %v350_v60  ;;  %v359_v37 = vsel %vm346_vm0, %v334_v16, 0.0  ;;  %v304_v38 = vadd.f32 %v288_v17, %v1385_v63  ;;  %v1447_v16 = vld [vmem:[%s1222_s18 + $0x68] sm:$0xff]  ;;  %2155 = vst [vmem:[#allocation21_spill] sm:$0xff] %v1474_v30  ;;  %v1509_v4 = vld [vmem:[%s1234_s24 + $0x70] sm:$0xff] }
  0x22   : > { %v362_v14 = vsel %vm346_vm0, %v335_v54, 0.0  ;;  %2147 = vst [vmem:[#allocation13_spill] sm:$0xff] %v1410_v29  ;;  %v1423_v41 = vmul.f32 %v1391_v8, %v1388_v7  ;;  %v290_v42 = vmul.f32 %v1394_v10, %v1388_v7  ;;  %v337_v50 = vadd.f32 %v321_v62, %v305_v28  ;;  %2151 = vst [vmem:[#allocation17_spill] sm:$0xff] %v1447_v16  ;;  %v1450_v17 = vld [vmem:[%s1228_s21 + $0x68] sm:$0xff] }
  0x23   : > { %v307_v51 = vadd.f32 %v291_v31, %v1410_v29  ;;  %v322_v53 = vmul.f32 %v1394_v10, %v1391_v8  ;;  %v1441_v54 = vmul.f32 %v1405_v24, %v1402_v22  ;;  %v336_v55 = vadd.f32 %v320_v21, %v304_v38  ;;  %v1453_v62 = vld [vmem:[%s1234_s24 + $0x68] sm:$0xff]  ;;  %v1467_v29 = vld [vmem:[%s1228_s21 + $0x60] sm:$0xff]  ;;  %2161 = vst [vmem:[#allocation27_spill] sm:$0xff] %v1509_v4 }
  0x24   : > { %2149 = vst [vmem:[#allocation15_spill] sm:$0xff] %v1423_v41  ;;  %v306_v60 = vadd.f32 %v290_v42, %v1423_v41  ;;  %v293_v61 = vmul.f32 %v1417_v36, %v1402_v22  ;;  %2152 = vst [vmem:[#allocation18_spill] sm:$0xff] %v1453_v62  ;;  %v325_v31 = vmul.f32 %v1417_v36, %v1405_v24  ;;  %v1464_v42 = vld [vmem:[%s1222_s18 + $0x60] sm:$0xff] }
  0x25   : > { %2150 = vst [vmem:[#allocation16_spill] sm:$0xff] %v1441_v54  ;;  %v339_v28 = vadd.f32 %v323_v35, %v307_v51  ;;  %v1459_v21 = vmul.f32 %v1431_v48, %v1428_v44  ;;  %v292_v38 = vmul.f32 %v1434_v49, %v1428_v44  ;;  %2154 = vst [vmem:[#allocation20_spill] sm:$0xff] %v1464_v42  ;;  %363 = vadd.xlane.f32.xlu1 %v362_v14 }
  0x26   : > { %360 = vadd.xlane.f32.xlu0 %v359_v37  ;;  %v368_v35 = vsel %vm346_vm0, %v337_v50, 0.0  ;;  %v338_v51 = vadd.f32 %v322_v53, %v306_v60  ;;  %v309_v56 = vadd.f32 %v293_v61, %v1441_v54  ;;  %v324_v41 = vmul.f32 %v1434_v49, %v1431_v48  ;;  %v1485_v50 = vld [vmem:[%s1222_s18 + $0x78] sm:$0xff] }
  0x27   : > { %2153 = vst [vmem:[#allocation19_spill] sm:$0xff] %v1459_v21  ;;  %v365_v63 = vsel %vm346_vm0, %v336_v55, 0.0  ;;  %v308_v15 = vadd.f32 %v292_v38, %v1459_v21  ;;  %v1480_v14 = vmul.f32 %v1450_v17, %v1447_v16  ;;  %v295_v37 = vmul.f32 %v1453_v62, %v1447_v16  ;;  %2157 = vst [vmem:[#allocation23_spill] sm:$0xff] %v1485_v50  ;;  %v1488_v53 = vld [vmem:[%s1228_s21 + $0x78] sm:$0xff]  ;;  %v1498_v55 = vld [vmem:[%s1222_s18 + $0x70] sm:$0xff] }
  0x28   : > { %v1492_v60 = vmul.f32 %v1467_v29, %v1464_v42  ;;  %v1495_v61 = vld [vmem:[%s1234_s24 + $0x78] sm:$0xff]  ;;  %2160 = vst [vmem:[#allocation26_spill] sm:$0xff] %v1498_v55  ;;  %v1501_v38 = vld [vmem:[%s1228_s21 + $0x70] sm:$0xff]  ;;  %v374_v54 = vsel %vm346_vm0, %v339_v28, 0.0  ;;  %v341_v21 = vadd.f32 %v325_v31, %v309_v56  ;;  %v327_v43 = vmul.f32 %v1453_v62, %v1450_v17 }
  0x29   : > { %2156 = vst [vmem:[#allocation22_spill] sm:$0xff] %v1480_v14  ;;  %2159 = vst [vmem:[#allocation25_spill] sm:$0xff] %v1495_v61  ;;  %v294_v23 = vmul.f32 %v1474_v30, %v1464_v42  ;;  %369 = vadd.xlane.f32.xlu1 %v368_v35  ;;  %v371_v9 = vsel %vm346_vm0, %v338_v51, 0.0  ;;  %v340_v16 = vadd.f32 %v324_v41, %v308_v15 }
  0x2a   : > { %2158 = vst [vmem:[#allocation24_spill] sm:$0xff] %v1492_v60  ;;  %366 = vadd.xlane.f32.xlu0 %v365_v63  ;;  %v311_v22 = vadd.f32 %v295_v37, %v1480_v14  ;;  %v326_v57 = vmul.f32 %v1474_v30, %v1467_v29  ;;  %v1518_v28 = vmul.f32 %v1488_v53, %v1485_v50  ;;  %v380_v41 = vsel %vm346_vm0, %v341_v21, 0.0 }
  0x2b   : > { %v310_v56 = vadd.f32 %v294_v23, %v1492_v60  ;;  %v297_v31 = vmul.f32 %v1495_v61, %v1485_v50  ;;  %v1524_v63 = vmul.f32 %v1501_v38, %v1498_v55  ;;  %v296_v15 = vmul.f32 %v1509_v4, %v1498_v55 }
  0x2c   : > { %2162 = vst [vmem:[#allocation28_spill] sm:$0xff] %v1518_v28  ;;  %v377_v23 = vsel %vm346_vm0, %v340_v16, 0.0  ;;  %v343_v35 = vadd.f32 %v327_v43, %v311_v22  ;;  %v329_v51 = vmul.f32 %v1495_v61, %v1488_v53  ;;  %v328_v50 = vmul.f32 %v1509_v4, %v1501_v38 }
  0x2d   : > { %2163 = vst [vmem:[#allocation29_spill] sm:$0xff] %v1524_v63  ;;  %375 = vadd.xlane.f32.xlu1 %v374_v54  ;;  %v342_v37 = vadd.f32 %v326_v57, %v310_v56  ;;  %v313_v14 = vadd.f32 %v297_v31, %v1518_v28  ;;  %v312_v60 = vadd.f32 %v296_v15, %v1524_v63 }
  0x2e   : > { %372 = vadd.xlane.f32.xlu0 %v371_v9  ;;  %v386_v9 = vsel %vm346_vm0, %v343_v35, 0.0 }
  0x2f   : > { %v383_v54 = vsel %vm346_vm0, %v342_v37, 0.0  ;;  %v345_v21 = vadd.f32 %v329_v51, %v313_v14  ;;  %v344_v16 = vadd.f32 %v328_v50, %v312_v60 }
  0x31   : > { %381 = vadd.xlane.f32.xlu1 %v380_v41  ;;  %v392_v43 = vsel %vm346_vm0, %v345_v21, 0.0  ;;  %v389_v57 = vsel %vm346_vm0, %v344_v16, 0.0 }
  0x32   : > { %378 = vadd.xlane.f32.xlu0 %v377_v23 }
  0x35   : > { %387 = vadd.xlane.f32.xlu1 %v386_v9 }
  0x36   : > { %384 = vadd.xlane.f32.xlu0 %v383_v54 }
  0x39   : > { %393 = vadd.xlane.f32.xlu1 %v392_v43 }
  0x3a   : > { %390 = vadd.xlane.f32.xlu0 %v389_v57 }
  0x4a   : > { %429 = vrot.lane.b32.xlu1 %v1291_v19, %s1185_s25 }
  0x4e   : > { %431 = vrot.lane.b32.xlu1 %v1240_v1, %s1185_s25 }
  0x50   : > { %427 = vrot.lane.b32.xlu0 %v1253_v5, %s1185_s25 }
  0x52   : > { %433 = vrot.lane.b32.xlu1 %v1272_v12, %s1185_s25 }
  0x54   : > { %435 = vrot.lane.b32.xlu0 %v1326_v33, %s1185_s25 }
  0x56   : > { %437 = vrot.lane.b32.xlu1 %v1308_v26, %s1185_s25 }
  0x58   : > { %587 = vrot.lane.b32.xlu0 %v1253_v5, %s1186_s26 }
  0x5a   : > { %589 = vrot.lane.b32.xlu1 %v1291_v19, %s1186_s26 }
  0x5c   : > { %591 = vrot.lane.b32.xlu0 %v1240_v1, %s1186_s26 }
  0x5e   : > { %593 = vrot.lane.b32.xlu1 %v1272_v12, %s1186_s26 }
  0x60   : > { %595 = vrot.lane.b32.xlu0 %v1326_v33, %s1186_s26 }
  0x62   : > { %597 = vrot.lane.b32.xlu1 %v1308_v26, %s1186_s26 }
  0x64   : > { %599 = vrot.lane.b32.xlu0 %v1354_v47, %s1186_s26 }
  0x66   : > { %601 = vrot.lane.b32.xlu1 %v1338_v40, %s1186_s26 }
  0x68   : > { %603 = vrot.lane.b32.xlu0 %v1391_v8, %s1186_s26 }
  0x6a   : > { %605 = vrot.lane.b32.xlu1 %v1373_v58, %s1186_s26 }
  0x6c   : > { %607 = vrot.lane.b32.xlu0 %v1431_v48, %s1186_s26 }
  0x6e   : > { %609 = vrot.lane.b32.xlu1 %v1405_v24, %s1186_s26 }
  0x70   : > { %611 = vrot.lane.b32.xlu0 %v1467_v29, %s1186_s26 }
  0x72   : > { %613 = vrot.lane.b32.xlu1 %v1450_v17, %s1186_s26 }
  0x74   : > { %615 = vrot.lane.b32.xlu0 %v1501_v38, %s1186_s26 }
  0x76   : > { %617 = vrot.lane.b32.xlu1 %v1488_v53, %s1186_s26 }
  0x78   : > { %747 = vrot.lane.b32.xlu0 %v1256_v6, %s1186_s26 }
  0x7a   : > { %749 = vrot.lane.b32.xlu1 %v1294_v20, %s1186_s26 }
  0x7c   : > { %751 = vrot.lane.b32.xlu0 %v1246_v3, %s1186_s26 }
  0x7e   : > { %753 = vrot.lane.b32.xlu1 %v1275_v13, %s1186_s26 }
  0x80   : > { %755 = vrot.lane.b32.xlu0 %v1329_v34, %s1186_s26 }
  0x82   : > { %757 = vrot.lane.b32.xlu1 %v1311_v27, %s1186_s26 }
  0x84   : > { %759 = vrot.lane.b32.xlu0 %v1361_v52, %s1186_s26 }
  0x86   : > { %761 = vrot.lane.b32.xlu1 %v1348_v45, %s1186_s26 }
  0x88   : > { %763 = vrot.lane.b32.xlu0 %v1394_v10, %s1186_s26 }
  0x8a   : > { %765 = vrot.lane.b32.xlu1 %v1376_v59, %s1186_s26 }
  0x8c   : > { %767 = vrot.lane.b32.xlu0 %v1434_v49, %s1186_s26 }
  0x8e   : > { %769 = vrot.lane.b32.xlu1 %v1417_v36, %s1186_s26 }
  0x90   : > { %771 = vrot.lane.b32.xlu0 %v1474_v30, %s1186_s26 }
  0x92   : > { %773 = vrot.lane.b32.xlu1 %v1453_v62, %s1186_s26 }
  0x94   : > { %775 = vrot.lane.b32.xlu0 %v1509_v4, %s1186_s26 }
  0x96   : > { %777 = vrot.lane.b32.xlu1 %v1495_v61, %s1186_s26 }
  0x98   : > { %439 = vrot.lane.b32.xlu0 %v1354_v47, %s1185_s25 }
  0x9a   : > { %441 = vrot.lane.b32.xlu1 %v1338_v40, %s1185_s25 }
  0x9c   : > { %443 = vrot.lane.b32.xlu0 %v1391_v8, %s1185_s25 }
  0x9e   : > { %445 = vrot.lane.b32.xlu1 %v1373_v58, %s1185_s25 }
  0xa0   : > { %447 = vrot.lane.b32.xlu0 %v1431_v48, %s1185_s25 }
  0xa2   : > { %449 = vrot.lane.b32.xlu1 %v1405_v24, %s1185_s25 }
  0xa4   : > { %451 = vrot.lane.b32.xlu0 %v1467_v29, %s1185_s25 }
  0xa6   : > { %453 = vrot.lane.b32.xlu1 %v1450_v17, %s1185_s25 }
  0xa8   : > { %455 = vrot.lane.b32.xlu0 %v1501_v38, %s1185_s25 }
  0xaa   : > { %v1634_v1 = vpop.xlane.xlu1 %354  ;;  %v1636_v5 = vpop.xlane.xlu0 %348  ;;  %457 = vrot.lane.b32.xlu1 %v1488_v53, %s1185_s25 }
  0xab   : > { %2164 = vst [vmem:[#allocation30_spill] sm:$0xff] %v1634_v1  ;;  %2165 = vst [vmem:[#allocation31_spill] sm:$0xff] %v1636_v5  ;;  %v2194_v1 = vld [vmem:[#allocation13_spill] sm:$0xff]  ;;  %v2195_v5 = vld [vmem:[#allocation24_spill] sm:$0xff] }
  0xac   : > { %507 = vrot.lane.b32.xlu0 %v1256_v6, %s1185_s25 }
  0xae   : > { %v1642_v12 = vpop.xlane.xlu1 %357  ;;  %v1644_v19 = vpop.xlane.xlu0 %351  ;;  %509 = vrot.lane.b32.xlu1 %v1294_v20, %s1185_s25 }
  0xaf   : > { %2166 = vst [vmem:[#allocation32_spill] sm:$0xff] %v1642_v12  ;;  %2167 = vst [vmem:[#allocation33_spill] sm:$0xff] %v1644_v19  ;;  %v2192_v12 = vld [vmem:[#allocation8_spill] sm:$0xff]  ;;  %v2193_v19 = vld [vmem:[#allocation19_spill] sm:$0xff] }
  0xb0   : > { %511 = vrot.lane.b32.xlu0 %v1246_v3, %s1185_s25 }
  0xb2   : > { %v1650_v26 = vpop.xlane.xlu1 %363  ;;  %513 = vrot.lane.b32.xlu1 %v1275_v13, %s1185_s25 }
  0xb3   : > { %2168 = vst [vmem:[#allocation34_spill] sm:$0xff] %v1650_v26  ;;  %v1652_v33 = vpop.xlane.xlu0 %360  ;;  %v2191_v26 = vld [vmem:[#allocation15_spill] sm:$0xff] }
  0xb4   : > { %2169 = vst [vmem:[#allocation35_spill] sm:$0xff] %v1652_v33  ;;  %515 = vrot.lane.b32.xlu0 %v1329_v34, %s1185_s25  ;;  %v2190_v33 = vld [vmem:[#allocation6_spill] sm:$0xff] }
  0xb6   : > { %v1658_v40 = vpop.xlane.xlu1 %369  ;;  %517 = vrot.lane.b32.xlu1 %v1311_v27, %s1185_s25 }
  0xb7   : > { %2170 = vst [vmem:[#allocation36_spill] sm:$0xff] %v1658_v40  ;;  %v1660_v47 = vpop.xlane.xlu0 %366  ;;  %v2189_v40 = vld [vmem:[#allocation11_spill] sm:$0xff] }
  0xb8   : > { %2171 = vst [vmem:[#allocation37_spill] sm:$0xff] %v1660_v47  ;;  %519 = vrot.lane.b32.xlu0 %v1361_v52, %s1185_s25  ;;  %v2188_v47 = vld [vmem:[#allocation4_spill] sm:$0xff] }
  0xba   : > { %v1666_v58 = vpop.xlane.xlu1 %375  ;;  %521 = vrot.lane.b32.xlu1 %v1348_v45, %s1185_s25 }
  0xbb   : > { %2172 = vst [vmem:[#allocation38_spill] sm:$0xff] %v1666_v58  ;;  %v1668_v8 = vpop.xlane.xlu0 %372  ;;  %v2187_v58 = vld [vmem:[#allocation7_spill] sm:$0xff] }
  0xbc   : > { %2173 = vst [vmem:[#allocation39_spill] sm:$0xff] %v1668_v8  ;;  %523 = vrot.lane.b32.xlu0 %v1394_v10, %s1185_s25  ;;  %v2186_v8 = vld [vmem:[#allocation5_spill] sm:$0xff] }
  0xbe   : > { %v1674_v22 = vpop.xlane.xlu1 %381  ;;  %525 = vrot.lane.b32.xlu1 %v1376_v59, %s1185_s25 }
  0xbf   : > { %2174 = vst [vmem:[#allocation40_spill] sm:$0xff] %v1674_v22  ;;  %v1676_v24 = vpop.xlane.xlu0 %378  ;;  %v2185_v22 = vld [vmem:[#allocation2_spill] sm:$0xff] }
  0xc0   : > { %2175 = vst [vmem:[#allocation41_spill] sm:$0xff] %v1676_v24  ;;  %527 = vrot.lane.b32.xlu0 %v1434_v49, %s1185_s25  ;;  %v2184_v24 = vld [vmem:[#allocation23_spill] sm:$0xff] }
  0xc2   : > { %v1682_v29 = vpop.xlane.xlu1 %387  ;;  %529 = vrot.lane.b32.xlu1 %v1417_v36, %s1185_s25 }
  0xc3   : > { %2176 = vst [vmem:[#allocation42_spill] sm:$0xff] %v1682_v29  ;;  %v1684_v48 = vpop.xlane.xlu0 %384  ;;  %v2183_v29 = vld [vmem:[#allocation3_spill] sm:$0xff] }
  0xc4   : > { %2177 = vst [vmem:[#allocation43_spill] sm:$0xff] %v1684_v48  ;;  %531 = vrot.lane.b32.xlu0 %v1474_v30, %s1185_s25  ;;  %v2182_v48 = vld [vmem:[#allocation17_spill] sm:$0xff] }
  0xc6   : > { %v1690_v17 = vpop.xlane.xlu1 %393  ;;  %533 = vrot.lane.b32.xlu1 %v1453_v62, %s1185_s25 }
  0xc7   : > { %2178 = vst [vmem:[#allocation44_spill] sm:$0xff] %v1690_v17  ;;  %v1692_v14 = vpop.xlane.xlu0 %390  ;;  %v2181_v17 = vld [vmem:[#allocation12_spill] sm:$0xff] }
  0xc8   : > { %2179 = vst [vmem:[#allocation45_spill] sm:$0xff] %v1692_v14  ;;  %535 = vrot.lane.b32.xlu0 %v1509_v4, %s1185_s25  ;;  %v2180_v14 = vld [vmem:[#allocation9_spill] sm:$0xff] }
  0xca   : > { %v1698_v50 = vpop.permute.xlu1 %429  ;;  %537 = vrot.lane.b32.xlu1 %v1495_v61, %s1185_s25 }
  0xcb   : > { %v1700_v53 = vpop.permute.xlu0 %427 }
  0xce   : > { %v1704_v60 = vpop.permute.xlu1 %431 }
  0xcf   : > { %v1706_v38 = vpop.permute.xlu0 %435 }
  0xd2   : > { %v1708_v56 = vpop.permute.xlu1 %433 }
  0xd3   : > { %v588_v31 = vpop.permute.xlu0 %587 }
  0xd4   : > { %v635_v15 = vmul.f32 %v588_v31, %v1243_v2 }
  0xd6   : > { %v651_v41 = vmul.f32 %v635_v15, %v1256_v6  ;;  %v1712_v23 = vpop.permute.xlu1 %437 }
  0xd7   : > { %v592_v35 = vpop.permute.xlu0 %591 }
  0xd8   : > { %v637_v51 = vmul.f32 %v592_v35, %v1237_v0  ;;  %683 = vrot.lane.b32.xlu0 %v651_v41, %s1185_s25 }
  0xda   : > { %v653_v37 = vmul.f32 %v637_v51, %v1246_v3  ;;  %v590_v9 = vpop.permute.xlu1 %589 }
  0xdb   : > { %v596_v54 = vpop.permute.xlu0 %595  ;;  %v636_v21 = vmul.f32 %v590_v9, %v1288_v18 }
  0xdc   : > { %v639_v16 = vmul.f32 %v596_v54, %v1323_v32  ;;  %687 = vrot.lane.b32.xlu0 %v653_v37, %s1185_s25 }
  0xdd   : > { %v652_v43 = vmul.f32 %v636_v21, %v1294_v20 }
  0xde   : > { %v655_v57 = vmul.f32 %v639_v16, %v1329_v34  ;;  %v594_v31 = vpop.permute.xlu1 %593 }
  0xdf   : > { %v600_v15 = vpop.permute.xlu0 %599  ;;  %v638_v35 = vmul.f32 %v594_v31, %v1269_v11  ;;  %685 = vrot.lane.b32.xlu1 %v652_v43, %s1185_s25 }
  0xe0   : > { %v641_v41 = vmul.f32 %v600_v15, %v1351_v46  ;;  %691 = vrot.lane.b32.xlu0 %v655_v57, %s1185_s25 }
  0xe1   : > { %v654_v51 = vmul.f32 %v638_v35, %v1275_v13 }
  0xe2   : > { %v657_v9 = vmul.f32 %v641_v41, %v1361_v52  ;;  %v598_v54 = vpop.permute.xlu1 %597 }
  0xe3   : > { %v604_v37 = vpop.permute.xlu0 %603  ;;  %v640_v21 = vmul.f32 %v598_v54, %v1305_v25  ;;  %689 = vrot.lane.b32.xlu1 %v654_v51, %s1185_s25 }
  0xe4   : > { %v643_v16 = vmul.f32 %v604_v37, %v1388_v7  ;;  %695 = vrot.lane.b32.xlu0 %v657_v9, %s1185_s25 }
  0xe5   : > { %v656_v31 = vmul.f32 %v640_v21, %v1311_v27 }
  0xe6   : > { %v659_v43 = vmul.f32 %v643_v16, %v1394_v10  ;;  %v602_v15 = vpop.permute.xlu1 %601 }
  0xe7   : > { %v608_v57 = vpop.permute.xlu0 %607  ;;  %v642_v35 = vmul.f32 %v602_v15, %v1335_v39  ;;  %693 = vrot.lane.b32.xlu1 %v656_v31, %s1185_s25 }
  0xe8   : > { %v645_v41 = vmul.f32 %v608_v57, %v1428_v44  ;;  %699 = vrot.lane.b32.xlu0 %v659_v43, %s1185_s25 }
  0xe9   : > { %v658_v54 = vmul.f32 %v642_v35, %v1348_v45 }
  0xea   : > { %v661_v51 = vmul.f32 %v645_v41, %v1434_v49  ;;  %v606_v37 = vpop.permute.xlu1 %605 }
  0xeb   : > { %v612_v9 = vpop.permute.xlu0 %611  ;;  %v644_v21 = vmul.f32 %v606_v37, %v2180_v14  ;;  %697 = vrot.lane.b32.xlu1 %v658_v54, %s1185_s25 }
  0xec   : > { %v647_v16 = vmul.f32 %v612_v9, %v1464_v42  ;;  %703 = vrot.lane.b32.xlu0 %v661_v51, %s1185_s25 }
  0xed   : > { %v660_v15 = vmul.f32 %v644_v21, %v1376_v59 }
  0xee   : > { %v663_v31 = vmul.f32 %v647_v16, %v1474_v30  ;;  %v610_v57 = vpop.permute.xlu1 %609 }
  0xef   : > { %v616_v43 = vpop.permute.xlu0 %615  ;;  %v646_v35 = vmul.f32 %v610_v57, %v2181_v17  ;;  %701 = vrot.lane.b32.xlu1 %v660_v15, %s1185_s25 }
  0xf0   : > { %v649_v41 = vmul.f32 %v616_v43, %v1498_v55  ;;  %707 = vrot.lane.b32.xlu0 %v663_v31, %s1185_s25 }
  0xf1   : > { %v662_v37 = vmul.f32 %v646_v35, %v1417_v36 }
  0xf2   : > { %v665_v54 = vmul.f32 %v649_v41, %v1509_v4  ;;  %v614_v9 = vpop.permute.xlu1 %613 }
  0xf3   : > { %v748_v51 = vpop.permute.xlu0 %747  ;;  %v648_v21 = vmul.f32 %v614_v9, %v2182_v48  ;;  %705 = vrot.lane.b32.xlu1 %v662_v37, %s1185_s25 }
  0xf4   : > { %v795_v16 = vmul.f32 %v748_v51, %v2183_v29  ;;  %711 = vrot.lane.b32.xlu0 %v665_v54, %s1185_s25 }
  0xf5   : > { %v664_v57 = vmul.f32 %v648_v21, %v1453_v62 }
  0xf6   : > { %v618_v43 = vpop.permute.xlu1 %617 }
  0xf7   : > { %v752_v15 = vpop.permute.xlu0 %751  ;;  %v650_v31 = vmul.f32 %v618_v43, %v2184_v24  ;;  %709 = vrot.lane.b32.xlu1 %v664_v57, %s1185_s25 }
  0xf8   : > { %v797_v35 = vmul.f32 %v752_v15, %v2185_v22  ;;  %827 = vrot.lane.b32.xlu0 %v795_v16, %s1185_s25 }
  0xf9   : > { %v666_v41 = vmul.f32 %v650_v31, %v1495_v61  ;;  %v2196_v61 = vld [vmem:[#allocation16_spill] sm:$0xff] }
  0xfa   : > { %v750_v9 = vpop.permute.xlu1 %749 }
  0xfb   : > { %v756_v51 = vpop.permute.xlu0 %755  ;;  %v796_v37 = vmul.f32 %v750_v9, %v2186_v8  ;;  %713 = vrot.lane.b32.xlu1 %v666_v41, %s1185_s25 }
  0xfc   : > { %v799_v54 = vmul.f32 %v756_v51, %v2187_v58  ;;  %831 = vrot.lane.b32.xlu0 %v797_v35, %s1185_s25 }
  0xfe   : > { %v754_v21 = vpop.permute.xlu1 %753 }
  0xff   : > { %v760_v43 = vpop.permute.xlu0 %759  ;;  %v798_v15 = vmul.f32 %v754_v21, %v2188_v47  ;;  %829 = vrot.lane.b32.xlu1 %v796_v37, %s1185_s25 }
 0x100   : > { %v801_v57 = vmul.f32 %v760_v43, %v2189_v40  ;;  %835 = vrot.lane.b32.xlu0 %v799_v54, %s1185_s25 }
 0x102   : > { %v758_v16 = vpop.permute.xlu1 %757 }
 0x103   : > { %v764_v31 = vpop.permute.xlu0 %763  ;;  %v800_v9 = vmul.f32 %v758_v16, %v2190_v33  ;;  %833 = vrot.lane.b32.xlu1 %v798_v15, %s1185_s25 }
 0x104   : > { %v803_v51 = vmul.f32 %v764_v31, %v2191_v26  ;;  %839 = vrot.lane.b32.xlu0 %v801_v57, %s1185_s25 }
 0x106   : > { %v762_v35 = vpop.permute.xlu1 %761 }
 0x107   : > { %v768_v41 = vpop.permute.xlu0 %767  ;;  %v802_v21 = vmul.f32 %v762_v35, %v2192_v12  ;;  %837 = vrot.lane.b32.xlu1 %v800_v9, %s1185_s25 }
 0x108   : > { %v805_v43 = vmul.f32 %v768_v41, %v2193_v19  ;;  %843 = vrot.lane.b32.xlu0 %v803_v51, %s1185_s25 }
 0x10a   : > { %v766_v37 = vpop.permute.xlu1 %765 }
 0x10b   : > { %v772_v54 = vpop.permute.xlu0 %771  ;;  %v804_v16 = vmul.f32 %v766_v37, %v2194_v1  ;;  %841 = vrot.lane.b32.xlu1 %v802_v21, %s1185_s25  ;;  %v2197_v37 = vld [vmem:[#allocation22_spill] sm:$0xff] }
 0x10c   : > { %v807_v31 = vmul.f32 %v772_v54, %v2195_v5  ;;  %847 = vrot.lane.b32.xlu0 %v805_v43, %s1185_s25 }
 0x10e   : > { %v770_v15 = vpop.permute.xlu1 %769 }
 0x10f   : > { %v776_v57 = vpop.permute.xlu0 %775  ;;  %v806_v35 = vmul.f32 %v770_v15, %v2196_v61  ;;  %845 = vrot.lane.b32.xlu1 %v804_v16, %s1185_s25 }
 0x110   : > { %v809_v41 = vmul.f32 %v776_v57, %v1524_v63  ;;  %851 = vrot.lane.b32.xlu0 %v807_v31, %s1185_s25 }
 0x112   : > { %v774_v9 = vpop.permute.xlu1 %773 }
 0x113   : > { %v1786_v51 = vpop.permute.xlu0 %439  ;;  %v808_v24 = vmul.f32 %v774_v9, %v2197_v37  ;;  %849 = vrot.lane.b32.xlu1 %v806_v35, %s1185_s25 }
 0x114   : > { %855 = vrot.lane.b32.xlu0 %v809_v41, %s1185_s25 }
 0x116   : > { %v778_v21 = vpop.permute.xlu1 %777 }
 0x117   : > { %v1791_v43 = vpop.permute.xlu0 %443  ;;  %v810_v54 = vmul.f32 %v778_v21, %v1518_v28  ;;  %853 = vrot.lane.b32.xlu1 %v808_v24, %s1185_s25 }
 0x11a   : > { %v1795_v15 = vpop.permute.xlu1 %441 }
 0x11b   : > { %v1797_v16 = vpop.permute.xlu0 %447  ;;  %857 = vrot.lane.b32.xlu1 %v810_v54, %s1185_s25 }
 0x11e   : > { %v1800_v31 = vpop.permute.xlu1 %445 }
 0x11f   : > { %2198 = vst [vmem:[#allocation3_spill] sm:$0xff] %v1800_v31  ;;  %v1802_v57 = vpop.permute.xlu0 %451 }
 0x120   : > { %2199 = vst [vmem:[#allocation2_spill] sm:$0xff] %v1802_v57 }
 0x122   : > { %v1804_v35 = vpop.permute.xlu1 %449 }
 0x123   : > { %2200 = vst [vmem:[#allocation5_spill] sm:$0xff] %v1804_v35  ;;  %v1806_v41 = vpop.permute.xlu0 %455 }
 0x124   : > { %2201 = vst [vmem:[#allocation7_spill] sm:$0xff] %v1806_v41 }
 0x126   : > { %v1808_v9 = vpop.permute.xlu1 %453 }
 0x127   : > { %2202 = vst [vmem:[#allocation4_spill] sm:$0xff] %v1808_v9  ;;  %v508_v37 = vpop.permute.xlu0 %507 }
 0x12a   : > { %v1810_v21 = vpop.permute.xlu1 %457 }
 0x12b   : > { %2203 = vst [vmem:[#allocation11_spill] sm:$0xff] %v1810_v21  ;;  %v512_v24 = vpop.permute.xlu0 %511 }
 0x12e   : > { %v510_v28 = vpop.permute.xlu1 %509 }
 0x12f   : > { %v516_v62 = vpop.permute.xlu0 %515 }
 0x132   : > { %v514_v48 = vpop.permute.xlu1 %513 }
 0x133   : > { %v520_v63 = vpop.permute.xlu0 %519 }
 0x136   : > { %v518_v4 = vpop.permute.xlu1 %517 }
 0x137   : > { %v1812_v54 = vpop.permute.xlu0 %523 }
 0x13a   : > { %v1814_v61 = vpop.permute.xlu1 %521 }
 0x13b   : > { %v1816_v36 = vpop.permute.xlu0 %527 }
 0x13c   : > { %2204 = vst [vmem:[#allocation6_spill] sm:$0xff] %v1816_v36  ;;  %v395_v36 = vmul.f32 %v2183_v29, %v1256_v6  ;;  %v396_v6 = vmul.f32 %v2186_v8, %v1294_v20 }
 0x13e   : > { %v1818_v55 = vpop.permute.xlu1 %525 }
 0x13f   : > { %2205 = vst [vmem:[#allocation15_spill] sm:$0xff] %v1818_v55  ;;  %v1820_v41 = vpop.permute.xlu0 %531 }
 0x140   : > { %2206 = vst [vmem:[#allocation8_spill] sm:$0xff] %v1820_v41 }
 0x142   : > { %v1822_v9 = vpop.permute.xlu1 %529 }
 0x143   : > { %2207 = vst [vmem:[#allocation46_spill] sm:$0xff] %v1822_v9  ;;  %v1824_v35 = vpop.permute.xlu0 %535 }
 0x144   : > { %2208 = vst [vmem:[#allocation47_spill] sm:$0xff] %v1824_v35  ;;  %v475_v35 = vmul.f32 %v1700_v53, %v1243_v2  ;;  %v397_v2 = vmul.f32 %v2185_v22, %v1246_v3  ;;  %v476_v53 = vmul.f32 %v1698_v50, %v1288_v18  ;;  %v478_v18 = vmul.f32 %v1708_v56, %v1269_v11 }
 0x146   : > { %v1826_v21 = vpop.permute.xlu1 %533  ;;  %v558_v20 = vmul.f32 %v514_v48, %v478_v18  ;;  %v2227_v18 = vld [vmem:[#allocation24_spill] sm:$0xff] }
 0x147   : > { %2209 = vst [vmem:[#allocation48_spill] sm:$0xff] %v1826_v21 }
 0x14a   : > { %v684_v17 = vpop.permute.xlu0 %683  ;;  %v1828_v5 = vpop.permute.xlu1 %537 }
 0x14b   : > { %2210 = vst [vmem:[#allocation49_spill] sm:$0xff] %v1828_v5  ;;  %v555_v5 = vmul.f32 %v508_v37, %v475_v35  ;;  %v479_v37 = vmul.f32 %v1706_v38, %v1323_v32  ;;  %v481_v32 = vmul.f32 %v1786_v51, %v1351_v46  ;;  %v483_v46 = vmul.f32 %v1791_v43, %v1388_v7 }
 0x14d   : > { %v563_v56 = vmul.f32 %v1812_v54, %v483_v46  ;;  %v2218_v54 = vld [vmem:[#allocation3_spill] sm:$0xff]  ;;  %v2231_v46 = vld [vmem:[#allocation26_spill] sm:$0xff] }
 0x14e   : > { %v688_v30 = vpop.permute.xlu0 %687 }
 0x151   : > { %v686_v1 = vpop.permute.xlu1 %685 }
 0x152   : > { %v692_v59 = vpop.permute.xlu0 %691 }
 0x155   : > { %v690_v57 = vpop.permute.xlu1 %689 }
 0x156   : > { %v696_v42 = vpop.permute.xlu0 %695 }
 0x159   : > { %v1830_v31 = vpop.permute.xlu1 %693 }
 0x15a   : > { %2211 = vst [vmem:[#allocation50_spill] sm:$0xff] %v1830_v31  ;;  %v1832_v14 = vpop.permute.xlu0 %699  ;;  %v477_v31 = vmul.f32 %v1704_v60, %v1237_v0  ;;  %v399_v0 = vmul.f32 %v2187_v58, %v1329_v34  ;;  %v398_v34 = vmul.f32 %v2188_v47, %v1275_v13  ;;  %v561_v58 = vmul.f32 %v520_v63, %v481_v32 }
 0x15b   : > { %2212 = vst [vmem:[#allocation51_spill] sm:$0xff] %v1832_v14  ;;  %v403_v63 = vmul.f32 %v2191_v26, %v1394_v10  ;;  %v402_v26 = vmul.f32 %v2192_v12, %v1348_v45 }
 0x15c   : > { %v574_v47 = vadd.f32 %v558_v20, %v398_v34  ;;  %v2228_v34 = vld [vmem:[#allocation8_spill] sm:$0xff] }
 0x15d   : > { %v1834_v55 = vpop.permute.xlu1 %697 }
 0x15e   : > { %2213 = vst [vmem:[#allocation52_spill] sm:$0xff] %v1834_v55  ;;  %v1836_v41 = vpop.permute.xlu0 %703  ;;  %v557_v55 = vmul.f32 %v512_v24, %v477_v31  ;;  %v734_v7 = vadd.f32 %v690_v57, %v574_v47  ;;  %v2217_v57 = vld [vmem:[#allocation9_spill] sm:$0xff] }
 0x15f   : > { %2214 = vst [vmem:[#allocation53_spill] sm:$0xff] %v1836_v41  ;;  %v571_v41 = vadd.f32 %v555_v5, %v395_v36  ;;  %v556_v36 = vmul.f32 %v510_v28, %v476_v53  ;;  %v559_v5 = vmul.f32 %v516_v62, %v479_v37  ;;  %v401_v28 = vmul.f32 %v2189_v40, %v1361_v52  ;;  %v2219_v53 = vld [vmem:[#allocation20_spill] sm:$0xff]  ;;  %v2220_v37 = vld [vmem:[#allocation2_spill] sm:$0xff] }
 0x160   : > { %v573_v31 = vadd.f32 %v557_v55, %v397_v2  ;;  %v400_v52 = vmul.f32 %v2190_v33, %v1311_v27  ;;  %v2215_v33 = vld [vmem:[#allocation19_spill] sm:$0xff]  ;;  %v484_v2 = vmul.f32 %v2218_v54, %v2217_v57  ;;  %v2243_v57 = vld [vmem:[#allocation18_spill] sm:$0xff] }
 0x161   : > { %v1840_v21 = vpop.permute.xlu1 %701  ;;  %v731_v35 = vadd.f32 %v684_v17, %v571_v41  ;;  %v572_v8 = vadd.f32 %v556_v36, %v396_v6  ;;  %v575_v11 = vadd.f32 %v559_v5, %v399_v0  ;;  %v405_v43 = vmul.f32 %v2215_v33, %v1434_v49  ;;  %v2223_v49 = vld [vmem:[#allocation15_spill] sm:$0xff]  ;;  %v2224_v36 = vld [vmem:[#allocation10_spill] sm:$0xff]  ;;  %v2225_v5 = vld [vmem:[#allocation13_spill] sm:$0xff] }
 0x162   : > { %v1842_v9 = vpop.permute.xlu0 %707  ;;  %v733_v22 = vadd.f32 %v688_v30, %v573_v31  ;;  %v480_v30 = vmul.f32 %v1712_v23, %v1305_v25  ;;  %v577_v25 = vadd.f32 %v561_v58, %v401_v28  ;;  %v2222_v0 = vld [vmem:[#allocation51_spill] sm:$0xff]  ;;  %v564_v12 = vmul.f32 %v2223_v49, %v484_v2  ;;  %v2244_v54 = vld [vmem:[#allocation22_spill] sm:$0xff] }
 0x163   : > { %v732_v48 = vadd.f32 %v686_v1, %v572_v8  ;;  %v735_v50 = vadd.f32 %v692_v59, %v575_v11  ;;  %v482_v59 = vmul.f32 %v1795_v15, %v1335_v39  ;;  %v2216_v15 = vld [vmem:[#allocation6_spill] sm:$0xff]  ;;  %v404_v31 = vmul.f32 %v2225_v5, %v2224_v36  ;;  %v2229_v11 = vld [vmem:[#allocation12_spill] sm:$0xff]  ;;  %v2246_v49 = vld [vmem:[#allocation23_spill] sm:$0xff] }
 0x164   : > { %v560_v13 = vmul.f32 %v518_v4, %v480_v30  ;;  %v485_v4 = vmul.f32 %v1797_v16, %v1428_v44  ;;  %v737_v1 = vadd.f32 %v696_v42, %v577_v25  ;;  %v579_v44 = vadd.f32 %v563_v56, %v403_v63  ;;  %v2236_v25 = vld [vmem:[#allocation14_spill] sm:$0xff]  ;;  %v2248_v36 = vld [vmem:[#allocation25_spill] sm:$0xff]  ;;  %v2249_v5 = vld [vmem:[#allocation28_spill] sm:$0xff] }
 0x165   : > { %v1848_v19 = vpop.permute.xlu1 %705  ;;  %v562_v27 = vmul.f32 %v1814_v61, %v482_v59  ;;  %v487_v61 = vmul.f32 %v2220_v37, %v2219_v53  ;;  %v580_v56 = vadd.f32 %v564_v12, %v404_v31  ;;  %v2238_v59 = vld [vmem:[#allocation27_spill] sm:$0xff]  ;;  %v408_v2 = vmul.f32 %v2244_v54, %v2243_v57 }
 0x166   : > { %v1850_v14 = vpop.permute.xlu0 %711  ;;  %v576_v10 = vadd.f32 %v560_v13, %v400_v52  ;;  %v565_v24 = vmul.f32 %v2216_v15, %v485_v4  ;;  %v739_v45 = vadd.f32 %v2222_v0, %v579_v44  ;;  %v2233_v13 = vld [vmem:[#allocation52_spill] sm:$0xff]  ;;  %v2234_v52 = vld [vmem:[#allocation53_spill] sm:$0xff]  ;;  %v2247_v12 = vld [vmem:[#allocation11_spill] sm:$0xff]  ;;  %v410_v31 = vmul.f32 %v2249_v5, %v2248_v36 }
 0x167   : > { %v567_v28 = vmul.f32 %v2228_v34, %v487_v61  ;;  %v2239_v4 = vld [vmem:[#allocation29_spill] sm:$0xff]  ;;  %v2242_v15 = vld [vmem:[#allocation4_spill] sm:$0xff]  ;;  %v740_v44 = vadd.f32 %v1840_v21, %v580_v56  ;;  %v490_v21 = vmul.f32 %v2247_v12, %v2246_v49  ;;  %v2251_v54 = vld [vmem:[#allocation31_spill] sm:$0xff] }
 0x168   : > { %v2245_v61 = vld [vmem:[#allocation48_spill] sm:$0xff]  ;;  %v2253_v12 = vld [vmem:[#allocation33_spill] sm:$0xff] }
 0x169   : > { %v1862_v29 = vpop.permute.xlu1 %709  ;;  %v2254_v5 = vld [vmem:[#allocation32_spill] sm:$0xff] }
 0x16a   : > { %v828_v60 = vpop.permute.xlu0 %827 }
 0x16b   : > { %v875_v3 = vsub.f32 %v731_v35, %v828_v60  ;;  %v2221_v35 = vld [vmem:[#allocation50_spill] sm:$0xff]  ;;  %v578_v60 = vadd.f32 %v562_v27, %v402_v26 }
 0x16c   : > { %v736_v6 = vadd.f32 %v2221_v35, %v576_v10  ;;  %v2240_v10 = vld [vmem:[#allocation47_spill] sm:$0xff] }
 0x16d   : > { %907 = vrot.lane.b32.xlu0 %v875_v3, %s1187_s27  ;;  %v1873_v62 = vpop.permute.xlu1 %713  ;;  %v2226_v3 = vld [vmem:[#allocation21_spill] sm:$0xff]  ;;  %v738_v47 = vadd.f32 %v2233_v13, %v578_v60 }
 0x16e   : > { %v832_v55 = vpop.permute.xlu0 %831  ;;  %v407_v32 = vmul.f32 %v2227_v18, %v2226_v3 }
 0x16f   : > { %v877_v17 = vsub.f32 %v733_v22, %v832_v55  ;;  %v581_v55 = vadd.f32 %v565_v24, %v405_v43 }
 0x170   : > { %v583_v33 = vadd.f32 %v567_v28, %v407_v32  ;;  %v2250_v32 = vld [vmem:[#allocation49_spill] sm:$0xff] }
 0x171   : > { %911 = vrot.lane.b32.xlu0 %v877_v17, %s1187_s27  ;;  %v830_v40 = vpop.permute.xlu1 %829  ;;  %v2230_v17 = vld [vmem:[#allocation5_spill] sm:$0xff]  ;;  %v741_v63 = vadd.f32 %v2234_v52, %v581_v55 }
 0x172   : > { %v836_v38 = vpop.permute.xlu0 %835  ;;  %v876_v23 = vsub.f32 %v732_v48, %v830_v40  ;;  %v486_v30 = vmul.f32 %v2230_v17, %v2229_v11  ;;  %v2232_v48 = vld [vmem:[#allocation7_spill] sm:$0xff]  ;;  %v2235_v40 = vld [vmem:[#allocation46_spill] sm:$0xff] }
 0x173   : > { %v879_v51 = vsub.f32 %v735_v50, %v836_v38  ;;  %v489_v50 = vmul.f32 %v2232_v48, %v2231_v46 }
 0x174   : > { %909 = vrot.lane.b32.xlu1 %v876_v23, %s1187_s27  ;;  %v566_v38 = vmul.f32 %v2235_v40, %v486_v30  ;;  %v2237_v23 = vld [vmem:[#allocation16_spill] sm:$0xff] }
 0x175   : > { %915 = vrot.lane.b32.xlu0 %v879_v51, %s1187_s27  ;;  %v834_v41 = vpop.permute.xlu1 %833  ;;  %v406_v51 = vmul.f32 %v2237_v23, %v2236_v25  ;;  %v569_v26 = vmul.f32 %v2240_v10, %v489_v50 }
 0x176   : > { %v840_v39 = vpop.permute.xlu0 %839  ;;  %v878_v16 = vsub.f32 %v734_v7, %v834_v41  ;;  %v409_v7 = vmul.f32 %v2239_v4, %v2238_v59 }
 0x177   : > { %v881_v42 = vsub.f32 %v737_v1, %v840_v39  ;;  %v2241_v39 = vld [vmem:[#allocation17_spill] sm:$0xff] }
 0x178   : > { %913 = vrot.lane.b32.xlu1 %v878_v16, %s1187_s27  ;;  %v488_v24 = vmul.f32 %v2242_v15, %v2241_v39  ;;  %v743_v16 = vadd.f32 %v1842_v9, %v583_v33 }
 0x179   : > { %919 = vrot.lane.b32.xlu0 %v881_v42, %s1187_s27  ;;  %v838_v22 = vpop.permute.xlu1 %837  ;;  %v582_v42 = vadd.f32 %v566_v38, %v406_v51 }
 0x17a   : > { %v844_v20 = vpop.permute.xlu0 %843  ;;  %v880_v58 = vsub.f32 %v736_v6, %v838_v22  ;;  %v568_v35 = vmul.f32 %v2245_v61, %v488_v24  ;;  %v585_v6 = vadd.f32 %v569_v26, %v409_v7  ;;  %v570_v22 = vmul.f32 %v2250_v32, %v490_v21 }
 0x17b   : > { %v883_v8 = vsub.f32 %v739_v45, %v844_v20  ;;  %v742_v9 = vadd.f32 %v1848_v19, %v582_v42 }
 0x17c   : > { %917 = vrot.lane.b32.xlu1 %v880_v58, %s1187_s27  ;;  %v745_v60 = vadd.f32 %v1850_v14, %v585_v6  ;;  %v584_v20 = vadd.f32 %v568_v35, %v408_v2  ;;  %v586_v14 = vadd.f32 %v570_v22, %v410_v31  ;;  %v2252_v35 = vld [vmem:[#allocation30_spill] sm:$0xff] }
 0x17d   : > { %923 = vrot.lane.b32.xlu0 %v883_v8, %s1187_s27  ;;  %v842_v1 = vpop.permute.xlu1 %841 }
 0x17e   : > { %v848_v27 = vpop.permute.xlu0 %847  ;;  %v882_v43 = vsub.f32 %v738_v47, %v842_v1  ;;  %v744_v55 = vadd.f32 %v1862_v29, %v584_v20  ;;  %v746_v8 = vadd.f32 %v1873_v62, %v586_v14  ;;  %v2255_v20 = vld [vmem:[#allocation34_spill] sm:$0xff] }
 0x17f   : > { %v885_v41 = vsub.f32 %v741_v63, %v848_v27 }
 0x180   : > { %921 = vrot.lane.b32.xlu1 %v882_v43, %s1187_s27 }
 0x181   : > { %927 = vrot.lane.b32.xlu0 %v885_v41, %s1187_s27  ;;  %v846_v53 = vpop.permute.xlu1 %845 }
 0x182   : > { %v852_v37 = vpop.permute.xlu0 %851  ;;  %v884_v0 = vsub.f32 %v740_v44, %v846_v53 }
 0x183   : > { %v887_v45 = vsub.f32 %v743_v16, %v852_v37 }
 0x184   : > { %925 = vrot.lane.b32.xlu1 %v884_v0, %s1187_s27 }
 0x185   : > { %931 = vrot.lane.b32.xlu0 %v887_v45, %s1187_s27  ;;  %v850_v3 = vpop.permute.xlu1 %849 }
 0x186   : > { %v856_v18 = vpop.permute.xlu0 %855  ;;  %v886_v34 = vsub.f32 %v742_v9, %v850_v3 }
 0x187   : > { %v889_v28 = vsub.f32 %v745_v60, %v856_v18 }
 0x188   : > { %929 = vrot.lane.b32.xlu1 %v886_v34, %s1187_s27 }
 0x189   : > { %935 = vrot.lane.b32.xlu0 %v889_v28, %s1187_s27  ;;  %v854_v19 = vpop.permute.xlu1 %853 }
 0x18a   : > { %v888_v58 = vsub.f32 %v744_v55, %v854_v19  ;;  %v2256_v55 = vld [vmem:[#allocation35_spill] sm:$0xff] }
 0x18c   : > { %933 = vrot.lane.b32.xlu1 %v888_v58, %s1187_s27 }
 0x18d   : > { %v858_v11 = vpop.permute.xlu1 %857 }
 0x18e   : > { %v890_v17 = vsub.f32 %v746_v8, %v858_v11 }
 0x190   : > { %937 = vrot.lane.b32.xlu1 %v890_v17, %s1187_s27 }
 0x1df   : > { %v908_v30 = vpop.permute.xlu0 %907 }
 0x1e0   : > { %v956_v46 = vsel %vm955_vm1, %v908_v30, 0.0  ;;  %v2257_v30 = vld [vmem:[#allocation36_spill] sm:$0xff] }
 0x1e1   : > { %957 = vadd.xlane.f32.xlu0 %v956_v46 }
 0x1e3   : > { %v912_v29 = vpop.permute.xlu0 %911 }
 0x1e4   : > { %v962_v48 = vsel %vm955_vm1, %v912_v29, 0.0 }
 0x1e5   : > { %963 = vadd.xlane.f32.xlu0 %v962_v48  ;;  %v2258_v48 = vld [vmem:[#allocation37_spill] sm:$0xff] }
 0x1e6   : > { %v910_v50 = vpop.permute.xlu1 %909 }
 0x1e7   : > { %v916_v13 = vpop.permute.xlu0 %915  ;;  %v959_v47 = vsel %vm955_vm1, %v910_v50, 0.0 }
 0x1e8   : > { %960 = vadd.xlane.f32.xlu1 %v959_v47  ;;  %v968_v56 = vsel %vm955_vm1, %v916_v13, 0.0 }
 0x1ea   : > { %v914_v62 = vpop.permute.xlu1 %913 }
 0x1eb   : > { %v920_v52 = vpop.permute.xlu0 %919  ;;  %v965_v63 = vsel %vm955_vm1, %v914_v62, 0.0 }
 0x1ec   : > { %966 = vadd.xlane.f32.xlu0 %v965_v63  ;;  %v974_v51 = vsel %vm955_vm1, %v920_v52, 0.0 }
 0x1ee   : > { %v918_v40 = vpop.permute.xlu1 %917 }
 0x1ef   : > { %v924_v38 = vpop.permute.xlu0 %923  ;;  %v971_v25 = vsel %vm955_vm1, %v918_v40, 0.0  ;;  %v2259_v40 = vld [vmem:[#allocation38_spill] sm:$0xff] }
 0x1f0   : > { %972 = vadd.xlane.f32.xlu1 %v971_v25  ;;  %969 = vadd.xlane.f32.xlu0 %v968_v56  ;;  %v980_v1 = vsel %vm955_vm1, %v924_v38, 0.0  ;;  %v2260_v25 = vld [vmem:[#allocation39_spill] sm:$0xff] }
 0x1f2   : > { %v922_v23 = vpop.permute.xlu1 %921 }
 0x1f3   : > { %v977_v59 = vsel %vm955_vm1, %v922_v23, 0.0  ;;  %v928_v4 = vpop.permute.xlu0 %927 }
 0x1f4   : > { %978 = vadd.xlane.f32.xlu1 %v977_v59  ;;  %975 = vadd.xlane.f32.xlu0 %v974_v51  ;;  %v986_v33 = vsel %vm955_vm1, %v928_v4, 0.0 }
 0x1f6   : > { %v926_v7 = vpop.permute.xlu1 %925 }
 0x1f7   : > { %v983_v27 = vsel %vm955_vm1, %v926_v7, 0.0  ;;  %v932_v10 = vpop.permute.xlu0 %931 }
 0x1f8   : > { %984 = vadd.xlane.f32.xlu1 %v983_v27  ;;  %981 = vadd.xlane.f32.xlu0 %v980_v1  ;;  %v992_v39 = vsel %vm955_vm1, %v932_v10, 0.0  ;;  %v2261_v27 = vld [vmem:[#allocation40_spill] sm:$0xff] }
 0x1fa   : > { %v930_v26 = vpop.permute.xlu1 %929 }
 0x1fb   : > { %v989_v43 = vsel %vm955_vm1, %v930_v26, 0.0  ;;  %v936_v24 = vpop.permute.xlu0 %935 }
 0x1fc   : > { %990 = vadd.xlane.f32.xlu1 %v989_v43  ;;  %987 = vadd.xlane.f32.xlu0 %v986_v33  ;;  %v998_v16 = vsel %vm955_vm1, %v936_v24, 0.0  ;;  %v2262_v33 = vld [vmem:[#allocation41_spill] sm:$0xff] }
 0x1fe   : > { %v934_v41 = vpop.permute.xlu1 %933 }
 0x1ff   : > { %v995_v15 = vsel %vm955_vm1, %v934_v41, 0.0 }
 0x200   : > { %996 = vadd.xlane.f32.xlu1 %v995_v15  ;;  %993 = vadd.xlane.f32.xlu0 %v992_v39 }
 0x202   : > { %v938_v44 = vpop.permute.xlu1 %937 }
 0x203   : > { %v1001_v42 = vsel %vm955_vm1, %v938_v44, 0.0 }
 0x204   : > { %1002 = vadd.xlane.f32.xlu1 %v1001_v42  ;;  %999 = vadd.xlane.f32.xlu0 %v998_v16  ;;  %v2263_v16 = vld [vmem:[#allocation42_spill] sm:$0xff] }
 0x26e   : > { %v958_v57 = vpop.xlane.xlu0 %957 }
 0x26f   : > { %v1004_v2 = vadd.f32 %v958_v57, %v2251_v54  ;;  %v1021_v53 = vsel %vm1020_vm2, %v2251_v54, %v958_v57  ;;  %v2264_v54 = vld [vmem:[#allocation43_spill] sm:$0xff] }
 0x271   : > { %v1038_v37 = vsel %vm1037_vm3, %v1021_v53, %v1004_v2 }
 0x272   : > { %1055 = vst.msk [vmem:[%s1969_s30] sm:$0xff] %vm1054_vm4, %v1038_v37  ;;  %v964_v61 = vpop.xlane.xlu0 %963 }
 0x273   : > { %v1006_v6 = vadd.f32 %v964_v61, %v2252_v35  ;;  %v1023_v0 = vsel %vm1020_vm2, %v2252_v35, %v964_v61 }
 0x275   : > { %v1040_v45 = vsel %vm1037_vm3, %v1023_v0, %v1006_v6  ;;  %v961_v49 = vpop.xlane.xlu1 %960  ;;  %v2265_v0 = vld [vmem:[#allocation44_spill] sm:$0xff] }
 0x276   : > { %1057 = vst.msk [vmem:[%s1969_s30 + $0x10] sm:$0xff] %vm1054_vm4, %v1040_v45  ;;  %v1005_v21 = vadd.f32 %v961_v49, %v2253_v12  ;;  %v1022_v9 = vsel %vm1020_vm2, %v2253_v12, %v961_v49  ;;  %v2266_v12 = vld [vmem:[#allocation45_spill] sm:$0xff] }
 0x278   : > { %v1039_v60 = vsel %vm1037_vm3, %v1022_v9, %v1005_v21 }
 0x279   : > { %1056 = vst.msk [vmem:[%s1969_s30 + $0x8] sm:$0xff] %vm1054_vm4, %v1039_v60  ;;  %v967_v36 = vpop.xlane.xlu0 %966 }
 0x27a   : > { %v1007_v31 = vadd.f32 %v967_v36, %v2254_v5  ;;  %v1024_v3 = vsel %vm1020_vm2, %v2254_v5, %v967_v36 }
 0x27c   : > { %v1041_v18 = vsel %vm1037_vm3, %v1024_v3, %v1007_v31 }
 0x27d   : > { %1058 = vst.msk [vmem:[%s1969_s30 + $0x18] sm:$0xff] %vm1054_vm4, %v1041_v18  ;;  %v973_v32 = vpop.xlane.xlu1 %972  ;;  %v970_v22 = vpop.xlane.xlu0 %969 }
 0x27e   : > { %v1009_v34 = vadd.f32 %v973_v32, %v2255_v20  ;;  %v1026_v28 = vsel %vm1020_vm2, %v2255_v20, %v973_v32  ;;  %v1008_v19 = vadd.f32 %v970_v22, %v2256_v55  ;;  %v1025_v14 = vsel %vm1020_vm2, %v2256_v55, %v970_v22 }
 0x280   : > { %v1043_v58 = vsel %vm1037_vm3, %v1026_v28, %v1009_v34  ;;  %v1042_v8 = vsel %vm1037_vm3, %v1025_v14, %v1008_v19 }
 0x281   : > { %1060 = vst.msk [vmem:[%s1969_s30 + $0x28] sm:$0xff] %vm1054_vm4, %v1043_v58  ;;  %1059 = vst.msk [vmem:[%s1969_s30 + $0x20] sm:$0xff] %vm1054_vm4, %v1042_v8  ;;  %v979_v11 = vpop.xlane.xlu1 %978  ;;  %v976_v17 = vpop.xlane.xlu0 %975 }
 0x282   : > { %v1011_v46 = vadd.f32 %v979_v11, %v2257_v30  ;;  %v1028_v29 = vsel %vm1020_vm2, %v2257_v30, %v979_v11  ;;  %v1010_v50 = vadd.f32 %v976_v17, %v2258_v48  ;;  %v1027_v13 = vsel %vm1020_vm2, %v2258_v48, %v976_v17 }
 0x284   : > { %v1045_v47 = vsel %vm1037_vm3, %v1028_v29, %v1011_v46  ;;  %v1044_v62 = vsel %vm1037_vm3, %v1027_v13, %v1010_v50 }
 0x285   : > { %1062 = vst.msk [vmem:[%s1969_s30 + $0x38] sm:$0xff] %vm1054_vm4, %v1045_v47  ;;  %1061 = vst.msk [vmem:[%s1969_s30 + $0x30] sm:$0xff] %vm1054_vm4, %v1044_v62  ;;  %v985_v52 = vpop.xlane.xlu1 %984  ;;  %v982_v63 = vpop.xlane.xlu0 %981 }
 0x286   : > { %v1013_v38 = vadd.f32 %v985_v52, %v2259_v40  ;;  %v1030_v56 = vsel %vm1020_vm2, %v2259_v40, %v985_v52  ;;  %v1012_v23 = vadd.f32 %v982_v63, %v2260_v25  ;;  %v1029_v51 = vsel %vm1020_vm2, %v2260_v25, %v982_v63 }
 0x288   : > { %v1047_v59 = vsel %vm1037_vm3, %v1030_v56, %v1013_v38  ;;  %v1046_v4 = vsel %vm1037_vm3, %v1029_v51, %v1012_v23 }
 0x289   : > { %1064 = vst.msk [vmem:[%s1969_s30 + $0x48] sm:$0xff] %vm1054_vm4, %v1047_v59  ;;  %1063 = vst.msk [vmem:[%s1969_s30 + $0x40] sm:$0xff] %vm1054_vm4, %v1046_v4  ;;  %v991_v7 = vpop.xlane.xlu1 %990  ;;  %v988_v1 = vpop.xlane.xlu0 %987 }
 0x28a   : > { %v1015_v10 = vadd.f32 %v991_v7, %v2261_v27  ;;  %v1032_v26 = vsel %vm1020_vm2, %v2261_v27, %v991_v7  ;;  %v1014_v43 = vadd.f32 %v988_v1, %v2262_v33  ;;  %v1031_v41 = vsel %vm1020_vm2, %v2262_v33, %v988_v1 }
 0x28c   : > { %v1049_v39 = vsel %vm1037_vm3, %v1032_v26, %v1015_v10  ;;  %v1048_v15 = vsel %vm1037_vm3, %v1031_v41, %v1014_v43 }
 0x28d   : > { %1066 = vst.msk [vmem:[%s1969_s30 + $0x58] sm:$0xff] %vm1054_vm4, %v1049_v39  ;;  %1065 = vst.msk [vmem:[%s1969_s30 + $0x50] sm:$0xff] %vm1054_vm4, %v1048_v15  ;;  %v997_v24 = vpop.xlane.xlu1 %996  ;;  %v994_v44 = vpop.xlane.xlu0 %993 }
 0x28e   : > { %v1017_v42 = vadd.f32 %v997_v24, %v2263_v16  ;;  %v1034_v57 = vsel %vm1020_vm2, %v2263_v16, %v997_v24  ;;  %v1016_v2 = vadd.f32 %v994_v44, %v2264_v54  ;;  %v1033_v53 = vsel %vm1020_vm2, %v2264_v54, %v994_v44 }
 0x290   : > { %v1051_v37 = vsel %vm1037_vm3, %v1034_v57, %v1017_v42  ;;  %v1050_v61 = vsel %vm1037_vm3, %v1033_v53, %v1016_v2 }
 0x291   : > { %1068 = vst.msk [vmem:[%s1969_s30 + $0x68] sm:$0xff] %vm1054_vm4, %v1051_v37  ;;  %1067 = vst.msk [vmem:[%s1969_s30 + $0x60] sm:$0xff] %vm1054_vm4, %v1050_v61  ;;  %v1003_v35 = vpop.xlane.xlu1 %1002  ;;  %v1000_v6 = vpop.xlane.xlu0 %999 }
 0x292   : > { %v1019_v45 = vadd.f32 %v1003_v35, %v2265_v0  ;;  %v1036_v49 = vsel %vm1020_vm2, %v2265_v0, %v1003_v35  ;;  %v1018_v21 = vadd.f32 %v1000_v6, %v2266_v12  ;;  %v1035_v9 = vsel %vm1020_vm2, %v2266_v12, %v1000_v6 }
 0x294   : > { %v1053_v60 = vsel %vm1037_vm3, %v1036_v49, %v1019_v45  ;;  %v1052_v36 = vsel %vm1037_vm3, %v1035_v9, %v1018_v21 }
 0x295   : > { %1070 = vst.msk [vmem:[%s1969_s30 + $0x78] sm:$0xff] %vm1054_vm4, %v1053_v60  ;;  %1069 = vst.msk [vmem:[%s1969_s30 + $0x70] sm:$0xff] %vm1054_vm4, %v1052_v36 }
 0x296 PF: > { %s13_s12 = sadd.s32 1, %s1183_s12  }
 0x297   : > { %p10_p4 = scmp.ge.s32.totalorder %s13_s12, 6  }
 0x299   :  { %12 = sbr.rel (!%p10_p4) target bundleno = 1 (0x1), region = 68 }

</bundles_post_ra>
